<compile_context>
chip_gen: v6e
topology: v6e:2x2x1
jax: 0.10.0
libtpu: 0.0.40
codegen_flags: <defaults>
</compile_context>

<pallas_src>
import jax
import jax.numpy as jnp
from jax.experimental import pallas as pl
from jax.experimental.pallas import tpu as pltpu


def _round_up(v: int, m: int) -> int:
    return (v + m - 1) // m * m


def _expert_kernel(x_ref, w_ref, b_ref, o_ref, acc_ref):
    k = pl.program_id(2)

    @pl.when(k == 0)
    def _():
        # Seed the accumulator with the bias -> no epilogue add needed.
        acc_ref[...] = jnp.broadcast_to(b_ref[...], acc_ref.shape)

    # x_ref: (tm, tk), w_ref: (tk, tn)  -- standard contraction, f32 acc.
    acc_ref[...] += jnp.dot(x_ref[...], w_ref[...],
                            preferred_element_type=jnp.float32)

    @pl.when(k == pl.num_programs(2) - 1)
    def _():
        o_ref[...] = jnp.maximum(acc_ref[...], 0.0).astype(o_ref.dtype)


def _pick_tile(total: int, cap: int) -> int:
    """Largest divisor of `total` that is a multiple of 128 and <= cap."""
    if total <= cap:
        return total
    for cand in range(cap - cap % 128, 127, -128):
        if total % cand == 0:
            return cand
    return 128


def expert_layer(x, weight, bias, *, tm=None, tn=None, tk=None,
                 matmul_dtype=None, out_dtype=None):
    """y = relu(x @ weight.T + bias), matching nn.Linear(K, N) + nn.ReLU.

    x:      (M, K)
    weight: (N, K)   (PyTorch layout)
    bias:   (N,)
    """
    M, K = x.shape
    N, Kw = weight.shape
    assert K == Kw and bias.shape == (N,)
    out_dtype = x.dtype if out_dtype is None else out_dtype

    # --- One-time HBM prep (weight/bias are static params; amortized). ------
    w_kn = weight.T                       # (K, N): contract on RHS sublanes.
    if matmul_dtype is not None:
        # Cast in HBM (not in-kernel) -> halves weight/x DMA bytes for bf16.
        x = x.astype(matmul_dtype)
        w_kn = w_kn.astype(matmul_dtype)
    bias_f32 = bias.astype(jnp.float32)

    # Lane-dense padding (no-op for realistic 128-aligned expert shapes).
    Kp = _round_up(K, 128)
    Np = _round_up(N, 128)
    if Kp != K:
        x = jnp.pad(x, ((0, 0), (0, Kp - K)))
        w_kn = jnp.pad(w_kn, ((0, Kp - K), (0, 0)))
    if Np != N:
        w_kn = jnp.pad(w_kn, ((0, 0), (0, Np - N)))
        bias_f32 = jnp.pad(bias_f32, (0, Np - N))
    bias2d = bias_f32.reshape(1, Np)

    # --- Tile selection ------------------------------------------------------
    if tm is None:
        tm = 512 if M >= 512 else min(_round_up(M, 16), 256)
    if tn is None:
        tn = _pick_tile(Np, 512)
    if tk is None:
        tk = Kp if Kp <= 2048 else _pick_tile(Kp, 2048)
    assert tm % 8 == 0 and tn % 128 == 0 and tk % 128 == 0
    # K/N grids must divide exactly (padded reads on K would corrupt the acc).
    assert Np % tn == 0 and Kp % tk == 0

    grid = (pl.cdiv(M, tm), Np // tn, Kp // tk)

    # --- VMEM budget (generation-aware) --------------------------------------
    in_itemsize = jnp.dtype(x.dtype).itemsize
    out_itemsize = jnp.dtype(out_dtype).itemsize
    tile_bytes = (2 * (tm * tk + tk * tn + tn) * in_itemsize
                  + 2 * tm * tn * out_itemsize
                  + tm * tn * 4)
    try:
        phys = getattr(pltpu.get_tpu_info(), "vmem_capacity_bytes", None)
    except Exception:
        phys = None
    if not phys:
        phys = 64 * 1024 * 1024           # conservative fallback (v7x per-TC)
    cap = phys - max(8 * 1024 * 1024, phys // 8)   # leave compiler headroom
    vmem_limit = int(min(max(2 * tile_bytes, 32 * 1024 * 1024), cap))

    # Advisory cost estimate for the XLA scheduler.
    cost = pl.CostEstimate(
        flops=2 * M * N * K,
        transcendentals=0,
        bytes_accessed=(x.size + w_kn.size) * in_itemsize
                        + bias2d.size * 4 + M * Np * out_itemsize,
    )

    # --- BlockSpecs -----------------------------------------------------------
    x_spec = pl.BlockSpec((tm, tk), lambda i, j, k: (i, k))
    w_map = lambda i, j, k: (k, j)
    b_spec = pl.BlockSpec((1, tn), lambda i, j, k: (0, j))
    # Small-M calls are pure weight-streaming: deepen the weight pipeline.
    weight_steps = (Np // tn) * (Kp // tk)
    if M <= 256 and weight_steps >= 3:
        try:
            w_spec = pl.BlockSpec((tk, tn), w_map, pipeline_mode=pl.Buffered(3))
        except TypeError:   # older BlockSpec signature without pipeline_mode
            w_spec = pl.BlockSpec((tk, tn), w_map)
    else:
        w_spec = pl.BlockSpec((tk, tn), w_map)

    out = pl.pallas_call(
        _expert_kernel,
        out_shape=jax.ShapeDtypeStruct((M, Np), out_dtype),
        grid_spec=pltpu.PrefetchScalarGridSpec(
            num_scalar_prefetch=0,
            grid=grid,
            in_specs=[x_spec, w_spec, b_spec],
            out_specs=pl.BlockSpec((tm, tn), lambda i, j, k: (i, j)),
            scratch_shapes=[pltpu.VMEM((tm, tn), jnp.float32)],
        ),
        compiler_params=pltpu.CompilerParams(
            dimension_semantics=("parallel", "parallel", "arbitrary"),
            vmem_limit_bytes=vmem_limit,
        ),
        cost_estimate=cost,
    )(x, w_kn, bias2d)

    return out[:, :N] if Np != N else out


if __name__ == "__main__":
    key = jax.random.PRNGKey(0)
    kx, kw, kb = jax.random.split(key, 3)

    # 1) Small shapes implied by the module (nn.Linear(input_dim, output_dim)).
    batch, input_dim, output_dim = 8, 32, 32
    x = jax.random.normal(kx, (batch, input_dim), dtype=jnp.float32)
    bound = 1.0 / (input_dim ** 0.5)
    weight = jax.random.uniform(kw, (output_dim, input_dim), jnp.float32,
                                minval=-bound, maxval=bound)
    bias = jax.random.uniform(kb, (output_dim,), jnp.float32,
                              minval=-bound, maxval=bound)
    out = expert_layer(x, weight, bias)
    jax.block_until_ready(out)
    ref = jnp.maximum(x @ weight.T + bias, 0.0)
    assert out.shape == (batch, output_dim)
    assert jnp.allclose(out, ref, atol=1e-4, rtol=1e-4)

    # 2) Exercises K-accumulator pipeline, ragged M tile, padded N/K (f32).
    k2x, k2w, k2b = jax.random.split(jax.random.PRNGKey(1), 3)
    M2, Kd2, Nd2 = 100, 160, 200
    x2 = jax.random.normal(k2x, (M2, Kd2), dtype=jnp.float32)
    bnd2 = 1.0 / (Kd2 ** 0.5)
    w2 = jax.random.uniform(k2w, (Nd2, Kd2), jnp.float32, minval=-bnd2, maxval=bnd2)
    bi2 = jax.random.uniform(k2b, (Nd2,), jnp.float32, minval=-bnd2, maxval=bnd2)
    out2 = expert_layer(x2, w2, bi2, tm=32, tk=128)
    jax.block_until_ready(out2)
    ref2 = jnp.maximum(x2 @ w2.T + bi2, 0.0)
    assert out2.shape == (M2, Nd2)
    assert jnp.allclose(out2, ref2, atol=1e-4, rtol=1e-4)

    # 3) bf16-in-HBM weight stream + deep weight buffering (decode-style small M).
    k3x, k3w, k3b = jax.random.split(jax.random.PRNGKey(2), 3)
    M3, Kd3, Nd3 = 64, 1024, 1536
    x3 = jax.random.normal(k3x, (M3, Kd3), dtype=jnp.float32)
    bnd3 = 1.0 / (Kd3 ** 0.5)
    w3 = jax.random.uniform(k3w, (Nd3, Kd3), jnp.float32, minval=-bnd3, maxval=bnd3)
    bi3 = jax.random.uniform(k3b, (Nd3,), jnp.float32, minval=-bnd3, maxval=bnd3)
    out3 = expert_layer(x3, w3, bi3, matmul_dtype=jnp.bfloat16)
    jax.block_until_ready(out3)
    ref3 = jnp.maximum(
        x3.astype(jnp.bfloat16).astype(jnp.float32)
        @ w3.T.astype(jnp.bfloat16).astype(jnp.float32) + bi3, 0.0)
    assert out3.shape == (M3, Nd3)
    assert jnp.allclose(out3, ref3, atol=2e-2, rtol=2e-2)

    print("KERNEL_OK")
</pallas_src>

<mosaic_0001>
module attributes {stable_mosaic.version = 11 : i64} {
  func.func @_expert_kernel(%arg0: i32, %arg1: i32, %arg2: i32, %arg3: memref<16x128xf32, #tpu.memory_space<vmem>>, %arg4: memref<128x128xf32, #tpu.memory_space<vmem>>, %arg5: memref<1x128xf32, #tpu.memory_space<vmem>>, %arg6: memref<16x128xf32, #tpu.memory_space<vmem>>, %arg7: memref<16x128xf32, #tpu.memory_space<vmem>>) attributes {dimension_semantics = [#tpu.dimension_semantics<parallel>, #tpu.dimension_semantics<parallel>, #tpu.dimension_semantics<arbitrary>], iteration_bounds = array<i64: 1, 1, 1>, scalar_prefetch = 0 : i64, scratch_operands = 1 : i64, tpu.core_type = #tpu.core_type<tc>, window_params = [{transform_indices = @transform_0, window_bounds = array<i64: 16, 128>}, {transform_indices = @transform_1, window_bounds = array<i64: 128, 128>}, {transform_indices = @transform_2, window_bounds = array<i64: 1, 128>}, {transform_indices = @transform_3, window_bounds = array<i64: 16, 128>}]} {
    %c0_i32 = arith.constant 0 : i32
    %0 = arith.cmpi eq, %arg2, %c0_i32 : i32
    %1 = arith.extui %0 : i1 to i32
    %c0_i32_0 = arith.constant 0 : i32
    %2 = arith.cmpi ne, %1, %c0_i32_0 : i32
    scf.if %2 {
      %c0_10 = arith.constant 0 : index
      %c0_11 = arith.constant 0 : index
      %12 = vector.load %arg5[%c0_10, %c0_11] : memref<1x128xf32, #tpu.memory_space<vmem>>, vector<1x128xf32>
      %13 = vector.shape_cast %12 : vector<1x128xf32> to vector<1x128xf32>
      %14 = vector.broadcast %13 : vector<1x128xf32> to vector<16x128xf32>
      %c0_12 = arith.constant 0 : index
      %c0_13 = arith.constant 0 : index
      %15 = vector.load %arg7[%c0_12, %c0_13] : memref<16x128xf32, #tpu.memory_space<vmem>>, vector<16x128xf32>
      tpu.vector_store %arg7[%c0_12, %c0_13], %14 {strides = array<i32>} : memref<16x128xf32, #tpu.memory_space<vmem>>, vector<16x128xf32>,
    } else {
    }
    %c0 = arith.constant 0 : index
    %c0_1 = arith.constant 0 : index
    %3 = vector.load %arg7[%c0, %c0_1] : memref<16x128xf32, #tpu.memory_space<vmem>>, vector<16x128xf32>
    %c0_2 = arith.constant 0 : index
    %c0_3 = arith.constant 0 : index
    %4 = vector.load %arg3[%c0_2, %c0_3] : memref<16x128xf32, #tpu.memory_space<vmem>>, vector<16x128xf32>
    %c0_4 = arith.constant 0 : index
    %c0_5 = arith.constant 0 : index
    %5 = vector.load %arg4[%c0_4, %c0_5] : memref<128x128xf32, #tpu.memory_space<vmem>>, vector<128x128xf32>
    %cst = arith.constant dense<0.000000e+00> : vector<16x128xf32>
    %6 = tpu.matmul %4, %5, %cst {dimension_numbers = #tpu.dot_dimension_numbers<[1], [0], [0], [1], [0, 0, 1, 1], [], []>} : vector<16x128xf32>, vector<128x128xf32>, vector<16x128xf32> -> vector<16x128xf32>
    %7 = arith.addf %3, %6 : vector<16x128xf32>
    %c0_6 = arith.constant 0 : index
    %c0_7 = arith.constant 0 : index
    %8 = vector.load %arg7[%c0_6, %c0_7] : memref<16x128xf32, #tpu.memory_space<vmem>>, vector<16x128xf32>
    tpu.vector_store %arg7[%c0_6, %c0_7], %7 {strides = array<i32>} : memref<16x128xf32, #tpu.memory_space<vmem>>, vector<16x128xf32>,
    %c0_i32_8 = arith.constant 0 : i32
    %9 = arith.cmpi eq, %arg2, %c0_i32_8 : i32
    %10 = arith.extui %9 : i1 to i32
    %c0_i32_9 = arith.constant 0 : i32
    %11 = arith.cmpi ne, %10, %c0_i32_9 : i32
    scf.if %11 {
      %c0_10 = arith.constant 0 : index
      %c0_11 = arith.constant 0 : index
      %12 = vector.load %arg7[%c0_10, %c0_11] : memref<16x128xf32, #tpu.memory_space<vmem>>, vector<16x128xf32>
      %cst_12 = arith.constant 0.000000e+00 : f32
      %13 = vector.broadcast %cst_12 : f32 to vector<16x128xf32>
      %14 = arith.maximumf %12, %13 : vector<16x128xf32>
      %c0_13 = arith.constant 0 : index
      %c0_14 = arith.constant 0 : index
      %15 = vector.load %arg6[%c0_13, %c0_14] : memref<16x128xf32, #tpu.memory_space<vmem>>, vector<16x128xf32>
      tpu.vector_store %arg6[%c0_13, %c0_14], %14 {strides = array<i32>} : memref<16x128xf32, #tpu.memory_space<vmem>>, vector<16x128xf32>,
    } else {
    }
    return
  }
  func.func @transform_0(%arg0: i32, %arg1: i32, %arg2: i32) -> (i32, i32) {
    %c0_i32 = arith.constant 0 : i32
    return %arg0, %arg2 : i32, i32
  }
  func.func @transform_1(%arg0: i32, %arg1: i32, %arg2: i32) -> (i32, i32) {
    %c0_i32 = arith.constant 0 : i32
    return %arg2, %arg1 : i32, i32
  }
  func.func @transform_2(%arg0: i32, %arg1: i32, %arg2: i32) -> (i32, i32) {
    %c0_i32 = arith.constant 0 : i32
    %c0_i32_0 = arith.constant 0 : i32
    return %c0_i32, %arg1 : i32, i32
  }
  func.func @transform_3(%arg0: i32, %arg1: i32, %arg2: i32) -> (i32, i32) {
    %c0_i32 = arith.constant 0 : i32
    return %arg0, %arg1 : i32, i32
  }
}

</mosaic_0001>

<bundles_post_ra>
// kernel: tpu_custom_call.1
= control target key start
LH: loop header
LB: loop body
LE: loop exit
PB: predicated region body
PF: predicated region fallthrough
CT: control target
= control target key end

     0   :  { %8 = vsyncpa [#allocation4], 0  ;;  %s353_s0 = inlined_call_operand.hbm [shape: f32[8,128], index: 0, kind: input, shape index: {}]   ;;  %s354_s1 = inlined_call_operand.hbm [shape: f32[128,128], index: 1, kind: input, shape index: {}]   ;;  %s355_s2 = inlined_call_operand.vmem [shape: f32[1,128], index: 2, kind: input, shape index: {}]   ;;  %s356_s3 = inlined_call_operand.hbm [shape: f32[8,128], index: 3, kind: output, shape index: {}]  }
   0x1   :  { %9 = vsyncpa [#allocation7], 0 }
   0x2   :  { %10 = vsyncpa [#allocation5], 0 }
   0x3   :  { %15 = vsyncadd [#allocation4], 128  ;;  %s307_s12 = smov [#allocation3]  }
   0x4   :  { %s16_s13 = sshll.u32 %s307_s12, 4  ;;  %s17_s13 = int_to_ptr.vmem [resolvable:$true] %s16_s13 }
   0x5   :  { %s249_s14 = scalar_lea.vmem %s17_s13, 128  ;;  %s253_s15 = scalar_lea.vmem %s17_s13, 256 }
   0x6   :  { %p250_p0 = scmp.ne.s32.totalorder %s17_s13, %s249_s14  ;;  %p254_p1 = scmp.lt.s32.totalorder %s17_s13, %s17_s13 }
   0x7   :  { %p255_p2 = scmp.lt.s32.totalorder %s253_s15, %s249_s14 }
   0x9   :  { %p256_p3 = por %p255_p2, %p254_p1 }
   0xb   :  { %p257_p4 = pnand %p256_p3, %p250_p0 }
   0xd   :  { %260 = shalt.err (!%p257_p4)
}
   0xe   :  { %s308_s16 = smov 128   ;;  %s309_s17 = smov 8  }
   0xf   :  { %22 = dma.hbm_to_vmem [thread:$0]  %s353_s0, 128, %s17_s13, [#allocation4], %s308_s16, %s308_s16, %s309_s17  }
  0x10   :  { %s310_s20 = smov [#allocation6]  }
  0x11   :  { %s28_s21 = sshll.u32 %s310_s20, 4  ;;  %s29_s21 = int_to_ptr.vmem [resolvable:$true] %s28_s21 }
  0x12   :  { %s269_s22 = scalar_lea.vmem %s29_s21, 2048  ;;  %p274_p6 = scmp.lt.s32.totalorder %s29_s21, %s29_s21 }
  0x13   :  { %p270_p5 = scmp.ne.s32.totalorder %s29_s21, %s269_s22  ;;  %p275_p7 = scmp.lt.s32.totalorder %s269_s22, %s269_s22 }
  0x15   :  { %p276_p8 = por %p275_p7, %p274_p6 }
  0x17   :  { %p277_p9 = pnand %p276_p8, %p270_p5 }
  0x19   :  { %280 = shalt.err (!%p277_p9)
}
  0x1a   :  { %34 = dma.hbm_to_vmem [thread:$0]  %s354_s1, 2048, %s29_s21, [#allocation7], %s308_s16, %s308_s16, %s309_s17  }
  0x1b   :  { %301 = dma.done.wait [#allocation4], 256  }
  0x1c   :  { %302 = vsyncadd [#allocation4], 4294967040 }
  0x1d   :  { %303 = dma.done.wait [#allocation7], 2048  }
  0x1e   :  { %304 = vsyncadd [#allocation7], 4294965248  ;;  %v75_v0 = vld [vmem:[#allocation6 + $0x78] sm:$0xff]  ;;  %v74_v1 = vld [vmem:[#allocation6 + $0x70] sm:$0xff] }
  0x1f   :  { %201 = vmatprep.subr.mxu0 %v75_v0  ;;  %v73_v2 = vld [vmem:[#allocation6 + $0x68] sm:$0xff]  ;;  %v72_v3 = vld [vmem:[#allocation6 + $0x60] sm:$0xff]  ;;  %v58_v4 = vld [vmem:[#allocation3] sm:$0xff] }
  0x20   :  { %202 = vmatpush3.msra.mxu0 %v75_v0  ;;  %v71_v5 = vld [vmem:[#allocation6 + $0x58] sm:$0xff]  ;;  %233 = vmatprep.mubr.f32.mxu0 %v58_v4  ;;  %v70_v6 = vld [vmem:[#allocation6 + $0x50] sm:$0xff]  ;;  %v69_v7 = vld [vmem:[#allocation6 + $0x48] sm:$0xff] }
  0x21   :  { %203 = vmatprep.subr.mxu0 %v74_v1  ;;  %v68_v8 = vld [vmem:[#allocation6 + $0x40] sm:$0xff]  ;;  %v67_v9 = vld [vmem:[#allocation6 + $0x38] sm:$0xff]  ;;  %v66_v10 = vld [vmem:[#allocation6 + $0x30] sm:$0xff] }
  0x22   :  { %204 = vmatpush3.msra.mxu0 %v74_v1  ;;  %v65_v11 = vld [vmem:[#allocation6 + $0x28] sm:$0xff]  ;;  %v64_v12 = vld [vmem:[#allocation6 + $0x20] sm:$0xff]  ;;  %v63_v13 = vld [vmem:[#allocation6 + $0x18] sm:$0xff] }
  0x23   :  { %205 = vmatprep.subr.mxu0 %v73_v2  ;;  %v62_v14 = vld [vmem:[#allocation6 + $0x10] sm:$0xff]  ;;  %v61_v15 = vld [vmem:[#allocation6 + $0x8] sm:$0xff]  ;;  %v60_v16 = vld [vmem:[#allocation6] sm:$0xff] }
  0x24   :  { %206 = vmatpush3.msra.mxu0 %v73_v2  ;;  %v59_v17 = vld [vmem:[#allocation3 + $0x8] sm:$0xff]  ;;  %v182_v18 = vld [vmem:[%s355_s2] ss:$0 sm:$0xff] }
  0x25   :  { %207 = vmatprep.subr.mxu0 %v72_v3 }
  0x26   :  { %208 = vmatpush3.msra.mxu0 %v72_v3 }
  0x27   :  { %209 = vmatprep.subr.mxu0 %v71_v5 }
  0x28   :  { %210 = vmatpush3.msra.mxu0 %v71_v5 }
  0x29   :  { %211 = vmatprep.subr.mxu0 %v70_v6 }
  0x2a   :  { %212 = vmatpush3.msra.mxu0 %v70_v6 }
  0x2b   :  { %213 = vmatprep.subr.mxu0 %v69_v7 }
  0x2c   :  { %214 = vmatpush3.msra.mxu0 %v69_v7 }
  0x2d   :  { %215 = vmatprep.subr.mxu0 %v68_v8 }
  0x2e   :  { %216 = vmatpush3.msra.mxu0 %v68_v8 }
  0x2f   :  { %217 = vmatprep.subr.mxu0 %v67_v9 }
  0x30   :  { %218 = vmatpush3.msra.mxu0 %v67_v9 }
  0x31   :  { %219 = vmatprep.subr.mxu0 %v66_v10 }
  0x32   :  { %220 = vmatpush3.msra.mxu0 %v66_v10 }
  0x33   :  { %221 = vmatprep.subr.mxu0 %v65_v11 }
  0x34   :  { %222 = vmatpush3.msra.mxu0 %v65_v11 }
  0x35   :  { %223 = vmatprep.subr.mxu0 %v64_v12 }
  0x36   :  { %224 = vmatpush3.msra.mxu0 %v64_v12 }
  0x37   :  { %225 = vmatprep.subr.mxu0 %v63_v13 }
  0x38   :  { %226 = vmatpush3.msra.mxu0 %v63_v13 }
  0x39   :  { %227 = vmatprep.subr.mxu0 %v62_v14 }
  0x3a   :  { %228 = vmatpush3.msra.mxu0 %v62_v14 }
  0x3b   :  { %229 = vmatprep.subr.mxu0 %v61_v15 }
  0x3c   :  { %230 = vmatpush3.msra.mxu0 %v61_v15 }
  0x3d   :  { %231 = vmatprep.subr.mxu0 %v60_v16 }
  0x3e   :  { %232 = vmatpush3.msra.mxu0 %v60_v16 }
  0x3f   :  { %234 = vmatmul.mubr.f32.vlgmr.msra.gmra.mxu0 %v59_v17 }
  0xff   :  { %v235_v19 = vpop.f32.mrf.mxu0 }
 0x100   :  { %v152_v20 = vadd.f32 %v235_v19, %v182_v18 }
 0x101   :  { %v142_v21 = vpop.f32.mrf.mxu0 }
 0x102   :  { %v161_v22 = vmax.f32 %v152_v20, 0.0  ;;  %v151_v23 = vadd.f32 %v182_v18, %v142_v21 }
 0x104   :  { %163 = vst [vmem:[#allocation8 + $0x8] sm:$0xff] %v161_v22  ;;  %v160_v24 = vmax.f32 %v151_v23, 0.0 }
 0x106   :  { %162 = vst [vmem:[#allocation8] sm:$0xff] %v160_v24 }
 0x107   :  { %168 = vsyncadd [#allocation5], 128  ;;  %s311_s25 = smov [#allocation8]  }
 0x108   :  { %s169_s26 = sshll.u32 %s311_s25, 4  ;;  %s170_s26 = int_to_ptr.vmem [resolvable:$true] %s169_s26 }
 0x109   :  { %s281_s27 = scalar_lea.vmem %s170_s26, 128  ;;  %s285_s28 = scalar_lea.vmem %s170_s26, 256 }
 0x10a   :  { %p282_p10 = scmp.ne.s32.totalorder %s170_s26, %s281_s27  ;;  %p286_p11 = scmp.lt.s32.totalorder %s170_s26, %s170_s26 }
 0x10b   :  { %p287_p12 = scmp.lt.s32.totalorder %s285_s28, %s281_s27 }
 0x10d   :  { %p288_p13 = por %p287_p12, %p286_p11 }
 0x10f   :  { %p289_p0 = pnand %p288_p13, %p282_p10 }
 0x111   :  { %292 = shalt.err (!%p289_p0)
}
 0x112   :  { %175 = dma.vmem_to_hbm [thread:$0]  %s170_s26, 128, %s356_s3, [#allocation5], %s308_s16, %s308_s16, %s309_s17  }
 0x113   :  { %305 = dma.done.wait [#allocation5], 256  }
 0x114   :  { %306 = vsyncadd [#allocation5], 4294967040 }
 0x115   :  { %179 = vsyncpa [#allocation4], 1 }
 0x116   :  { %180 = vsyncpa [#allocation7], 1 }
 0x117   :  { %181 = vsyncpa [#allocation5], 1 }

</bundles_post_ra>
